<compile_context>
chip_gen: v5e
topology: v5e:2x2
jax: 0.10.0
libtpu: 0.0.40
codegen_flags: <defaults>
</compile_context>

<pallas_src>
import jax
import jax.numpy as jnp
from jax.experimental import pallas as pl
from jax.experimental.pallas import tpu as pltpu

EPS = 1e-5  # nn.BatchNorm2d default eps


def sacat_resblock_kernel(p_ref, e_ref, wp_ref, o_ref):
    # p_ref : (9C, M)  im2col slab of x, tap-major rows k = (kh*3+kw)*C + ci.
    #                  Rows [4C, 5C) are the centre tap == unpadded x (residual).
    # e_ref : (C, M)   extractor, channels-major.
    # wp_ref: (C, 12C+4) coalesced [w1 | wa_h | wa_e | wb | gamma beta ba bb].
    # o_ref : (C, M)
    C, M = o_ref.shape
    K = 9 * C
    inv_m = 1.0 / M

    wp = wp_ref[...]
    w1 = wp[:, :K]                      # (C, 9C)
    wah = wp[:, K:K + C]                # (C, C)  h half of SACat.c0
    wae = wp[:, K + C:K + 2 * C]        # (C, C)  extractor half
    wb = wp[:, K + 2 * C:K + 3 * C]     # (C, C)  SACat.c1
    pbase = K + 3 * C
    gamma = wp[:, pbase:pbase + 1]      # (C, 1)
    beta = wp[:, pbase + 1:pbase + 2]
    ba = wp[:, pbase + 2:pbase + 3]
    bb = wp[:, pbase + 3:pbase + 4]

    # ---- Conv3x3 (bias cancelled by BN): one lane-dense MXU matmul ----------
    y = jnp.dot(w1, p_ref[...], preferred_element_type=jnp.float32)   # (C, M)

    # ---- BatchNorm2d (training mode): two-pass per-channel lane reductions --
    mean = jnp.sum(y, axis=1, keepdims=True) * inv_m                  # (C, 1)
    yc = y - mean
    var = jnp.sum(yc * yc, axis=1, keepdims=True) * inv_m             # biased
    h = jnp.maximum(yc * (jax.lax.rsqrt(var + EPS) * gamma) + beta, 0.0)

    # ---- SACat gate: channel concat folded into split weight halves ---------
    a = (jnp.dot(wah, h, preferred_element_type=jnp.float32)
         + jnp.dot(wae, e_ref[...], preferred_element_type=jnp.float32) + ba)
    a = jnp.maximum(a, 0.0)
    z = jnp.dot(wb, a, preferred_element_type=jnp.float32) + bb
    gate = 1.0 / (1.0 + jnp.exp(-z))                                  # sigmoid

    # ---- gate + residual (residual read from centre-tap rows of the slab) ---
    xres = p_ref[4 * C:5 * C, :]
    o_ref[...] = (h * gate + xres).astype(o_ref.dtype)


def sacat_resblock_pallas(x_nchw, extractor_nchw, params):
    """x, extractor: (N, C, H, W); params are PyTorch-layout tensors."""
    w1, b1, gamma, beta, wa, ba, wb, bb = params
    del b1  # cancelled exactly by train-mode BatchNorm mean subtraction
    N, C, H, W = x_nchw.shape
    Cout = w1.shape[0]
    assert Cout == C, "residual add requires in_ch == out_ch"
    M = N * H * W
    f32 = jnp.float32

    # Channels-major slabs: leading-axis transposes only (no minor-dim relayout).
    x_cm = jnp.transpose(x_nchw, (1, 0, 2, 3)).astype(f32)            # (C,N,H,W)
    e_cm = jnp.transpose(extractor_nchw, (1, 0, 2, 3)).astype(f32).reshape(C, M)

    # im2col slab built ONCE here (tap-major rows k=(kh*3+kw)*C+ci); the centre
    # tap rows double as the residual, so x is only DMA'd once into the kernel.
    xp = jnp.pad(x_cm, ((0, 0), (0, 0), (1, 1), (1, 1)))
    patches = jnp.concatenate(
        [xp[:, :, dh:dh + H, dw:dw + W].reshape(C, M)
         for dh in range(3) for dw in range(3)], axis=0)              # (9C, M)

    # All weights + per-channel params coalesced into ONE (C, 12C+4) slab.
    w1_mat = jnp.transpose(w1, (0, 2, 3, 1)).reshape(Cout, 9 * C).astype(f32)
    wah = wa[:, :Cout, 0, 0].astype(f32)      # cat([h, extractor]) -> h half
    wae = wa[:, Cout:, 0, 0].astype(f32)      #                      extractor half
    wbm = wb[:, :, 0, 0].astype(f32)
    col = lambda v: v.reshape(Cout, 1).astype(f32)
    wp = jnp.concatenate(
        [w1_mat, wah, wae, wbm, col(gamma), col(beta), col(ba), col(bb)], axis=1)

    cost = pl.CostEstimate(
        flops=2 * M * 9 * C * C + 3 * (2 * M * C * C),
        transcendentals=M * C + C,
        bytes_accessed=4 * (patches.size + e_cm.size + wp.size + C * M))

    def full2d(shape):
        return pl.BlockSpec(shape, lambda i: (0, 0))

    out_cm = pl.pallas_call(
        sacat_resblock_kernel,
        out_shape=jax.ShapeDtypeStruct((Cout, M), f32),
        grid_spec=pltpu.PrefetchScalarGridSpec(
            num_scalar_prefetch=0,
            grid=(1,),
            in_specs=[full2d((9 * C, M)),        # im2col slab (+ residual rows)
                      full2d((C, M)),            # extractor
                      full2d((C, 12 * C + 4))],  # coalesced weights/params
            out_specs=full2d((Cout, M)),
        ),
        compiler_params=pltpu.CompilerParams(
            dimension_semantics=("arbitrary",)),
        cost_estimate=cost,
    )(patches, e_cm, wp)

    # Leading-axis transpose back to NCHW (no minor-dim relayout).
    return jnp.transpose(out_cm.reshape(Cout, N, H, W), (1, 0, 2, 3))


def sacat_resblock_reference(x, extractor, params):
    """Pure-JAX reference matching the PyTorch module's forward (train-mode BN)."""
    w1, b1, gamma, beta, wa, ba, wb, bb = [p.astype(jnp.float32) for p in params]
    x = x.astype(jnp.float32)
    extractor = extractor.astype(jnp.float32)

    def conv(v, w, b, pad):
        y = jax.lax.conv_general_dilated(
            v, w, window_strides=(1, 1), padding=((pad, pad), (pad, pad)),
            dimension_numbers=("NCHW", "OIHW", "NCHW"))
        return y + b.reshape(1, -1, 1, 1)

    y = conv(x, w1, b1, 1)
    mean = jnp.mean(y, axis=(0, 2, 3), keepdims=True)
    var = jnp.mean((y - mean) ** 2, axis=(0, 2, 3), keepdims=True)
    h = (y - mean) * jax.lax.rsqrt(var + EPS)
    h = h * gamma.reshape(1, -1, 1, 1) + beta.reshape(1, -1, 1, 1)
    h = jnp.maximum(h, 0.0)

    cat = jnp.concatenate([h, extractor], axis=1)
    a = jnp.maximum(conv(cat, wa, ba, 0), 0.0)
    gate = jax.nn.sigmoid(conv(a, wb, bb, 0))
    return h * gate + x


if __name__ == "__main__":
    N, C, H, W = 2, 4, 16, 16

    key = jax.random.PRNGKey(0)
    keys = jax.random.split(key, 10)
    x = jax.random.normal(keys[0], (N, C, H, W), dtype=jnp.float32)
    extractor = jax.random.normal(keys[1], (N, C, H, W), dtype=jnp.float32)
    w1 = 0.1 * jax.random.normal(keys[2], (C, C, 3, 3), dtype=jnp.float32)
    b1 = 0.1 * jax.random.normal(keys[3], (C,), dtype=jnp.float32)
    gamma = 1.0 + 0.1 * jax.random.normal(keys[4], (C,), dtype=jnp.float32)
    beta = 0.1 * jax.random.normal(keys[5], (C,), dtype=jnp.float32)
    wa = 0.1 * jax.random.normal(keys[6], (C, 2 * C, 1, 1), dtype=jnp.float32)
    ba = 0.1 * jax.random.normal(keys[7], (C,), dtype=jnp.float32)
    wb = 0.1 * jax.random.normal(keys[8], (C, C, 1, 1), dtype=jnp.float32)
    bb = 0.1 * jax.random.normal(keys[9], (C,), dtype=jnp.float32)
    params = (w1, b1, gamma, beta, wa, ba, wb, bb)

    out = jax.block_until_ready(sacat_resblock_pallas(x, extractor, params))
    ref = jax.block_until_ready(sacat_resblock_reference(x, extractor, params))

    assert out.shape == (N, C, H, W)
    assert jnp.allclose(out, ref, atol=1e-4, rtol=1e-4), (
        f"max abs diff {jnp.max(jnp.abs(out - ref))}")
    print("KERNEL_OK")
</pallas_src>

<mosaic_0001>
module attributes {stable_mosaic.version = 11 : i64} {
  func.func @sacat_resblock_kernel(%arg0: i32, %arg1: memref<36x512xf32, #tpu.memory_space<vmem>>, %arg2: memref<4x512xf32, #tpu.memory_space<vmem>>, %arg3: memref<4x52xf32, #tpu.memory_space<vmem>>, %arg4: memref<4x512xf32, #tpu.memory_space<vmem>>) attributes {dimension_semantics = [#tpu.dimension_semantics<arbitrary>], iteration_bounds = array<i64: 1>, scalar_prefetch = 0 : i64, scratch_operands = 0 : i64, tpu.core_type = #tpu.core_type<tc>, window_params = [{pipeline_mode = #tpu.pipeline_mode<synchronous>, transform_indices = @transform_0, window_bounds = array<i64: 36, 512>}, {pipeline_mode = #tpu.pipeline_mode<synchronous>, transform_indices = @transform_1, window_bounds = array<i64: 4, 512>}, {pipeline_mode = #tpu.pipeline_mode<synchronous>, transform_indices = @transform_2, window_bounds = array<i64: 4, 52>}, {pipeline_mode = #tpu.pipeline_mode<synchronous>, transform_indices = @transform_3, window_bounds = array<i64: 4, 512>}]} {
    %c0 = arith.constant 0 : index
    %c0_0 = arith.constant 0 : index
    %0 = vector.load %arg3[%c0, %c0_0] : memref<4x52xf32, #tpu.memory_space<vmem>>, vector<4x52xf32>
    %1 = vector.extract_strided_slice %0 {offsets = [0, 0], sizes = [4, 36], strides = [1, 1]} : vector<4x52xf32> to vector<4x36xf32>
    %2 = vector.extract_strided_slice %0 {offsets = [0, 36], sizes = [4, 4], strides = [1, 1]} : vector<4x52xf32> to vector<4x4xf32>
    %3 = vector.extract_strided_slice %0 {offsets = [0, 40], sizes = [4, 4], strides = [1, 1]} : vector<4x52xf32> to vector<4x4xf32>
    %4 = vector.extract_strided_slice %0 {offsets = [0, 44], sizes = [4, 4], strides = [1, 1]} : vector<4x52xf32> to vector<4x4xf32>
    %5 = vector.extract_strided_slice %0 {offsets = [0, 48], sizes = [4, 1], strides = [1, 1]} : vector<4x52xf32> to vector<4x1xf32>
    %6 = vector.extract_strided_slice %0 {offsets = [0, 49], sizes = [4, 1], strides = [1, 1]} : vector<4x52xf32> to vector<4x1xf32>
    %7 = vector.extract_strided_slice %0 {offsets = [0, 50], sizes = [4, 1], strides = [1, 1]} : vector<4x52xf32> to vector<4x1xf32>
    %8 = vector.extract_strided_slice %0 {offsets = [0, 51], sizes = [4, 1], strides = [1, 1]} : vector<4x52xf32> to vector<4x1xf32>
    %c0_1 = arith.constant 0 : index
    %c0_2 = arith.constant 0 : index
    %9 = vector.load %arg1[%c0_1, %c0_2] : memref<36x512xf32, #tpu.memory_space<vmem>>, vector<36x512xf32>
    %cst = arith.constant dense<0.000000e+00> : vector<4x512xf32>
    %10 = tpu.matmul %1, %9, %cst {dimension_numbers = #tpu.dot_dimension_numbers<[1], [0], [0], [1], [0, 0, 1, 1], [], []>} : vector<4x36xf32>, vector<36x512xf32>, vector<4x512xf32> -> vector<4x512xf32>
    %cst_3 = arith.constant dense<0.000000e+00> : vector<4xf32>
    %11 = vector.multi_reduction <add>, %10, %cst_3 [1] : vector<4x512xf32> to vector<4xf32>
    %12 = vector.shape_cast %11 : vector<4xf32> to vector<4x1xf32>
    %cst_4 = arith.constant 0.001953125 : f32
    %13 = vector.broadcast %cst_4 : f32 to vector<4x1xf32>
    %14 = arith.mulf %12, %13 : vector<4x1xf32>
    %15 = vector.broadcast %14 : vector<4x1xf32> to vector<4x512xf32>
    %16 = arith.subf %10, %15 : vector<4x512xf32>
    %17 = arith.mulf %16, %16 : vector<4x512xf32>
    %cst_5 = arith.constant dense<0.000000e+00> : vector<4xf32>
    %18 = vector.multi_reduction <add>, %17, %cst_5 [1] : vector<4x512xf32> to vector<4xf32>
    %19 = vector.shape_cast %18 : vector<4xf32> to vector<4x1xf32>
    %cst_6 = arith.constant 0.001953125 : f32
    %20 = vector.broadcast %cst_6 : f32 to vector<4x1xf32>
    %21 = arith.mulf %19, %20 : vector<4x1xf32>
    %cst_7 = arith.constant 9.99999974E-6 : f32
    %22 = vector.broadcast %cst_7 : f32 to vector<4x1xf32>
    %23 = arith.addf %21, %22 : vector<4x1xf32>
    %24 = math.rsqrt %23 : vector<4x1xf32>
    %25 = arith.mulf %24, %5 : vector<4x1xf32>
    %26 = vector.broadcast %25 : vector<4x1xf32> to vector<4x512xf32>
    %27 = arith.mulf %16, %26 : vector<4x512xf32>
    %28 = vector.broadcast %6 : vector<4x1xf32> to vector<4x512xf32>
    %29 = arith.addf %27, %28 : vector<4x512xf32>
    %cst_8 = arith.constant 0.000000e+00 : f32
    %30 = vector.broadcast %cst_8 : f32 to vector<4x512xf32>
    %31 = arith.maximumf %29, %30 : vector<4x512xf32>
    %cst_9 = arith.constant dense<0.000000e+00> : vector<4x512xf32>
    %32 = tpu.matmul %2, %31, %cst_9 {dimension_numbers = #tpu.dot_dimension_numbers<[1], [0], [0], [1], [0, 0, 1, 1], [], []>} : vector<4x4xf32>, vector<4x512xf32>, vector<4x512xf32> -> vector<4x512xf32>
    %c0_10 = arith.constant 0 : index
    %c0_11 = arith.constant 0 : index
    %33 = vector.load %arg2[%c0_10, %c0_11] : memref<4x512xf32, #tpu.memory_space<vmem>>, vector<4x512xf32>
    %cst_12 = arith.constant dense<0.000000e+00> : vector<4x512xf32>
    %34 = tpu.matmul %3, %33, %cst_12 {dimension_numbers = #tpu.dot_dimension_numbers<[1], [0], [0], [1], [0, 0, 1, 1], [], []>} : vector<4x4xf32>, vector<4x512xf32>, vector<4x512xf32> -> vector<4x512xf32>
    %35 = arith.addf %32, %34 : vector<4x512xf32>
    %36 = vector.broadcast %7 : vector<4x1xf32> to vector<4x512xf32>
    %37 = arith.addf %35, %36 : vector<4x512xf32>
    %cst_13 = arith.constant 0.000000e+00 : f32
    %38 = vector.broadcast %cst_13 : f32 to vector<4x512xf32>
    %39 = arith.maximumf %37, %38 : vector<4x512xf32>
    %cst_14 = arith.constant dense<0.000000e+00> : vector<4x512xf32>
    %40 = tpu.matmul %4, %39, %cst_14 {dimension_numbers = #tpu.dot_dimension_numbers<[1], [0], [0], [1], [0, 0, 1, 1], [], []>} : vector<4x4xf32>, vector<4x512xf32>, vector<4x512xf32> -> vector<4x512xf32>
    %41 = vector.broadcast %8 : vector<4x1xf32> to vector<4x512xf32>
    %42 = arith.addf %40, %41 : vector<4x512xf32>
    %cst_15 = arith.constant 0.000000e+00 : f32
    %43 = vector.broadcast %cst_15 : f32 to vector<4x512xf32>
    %44 = arith.subf %43, %42 : vector<4x512xf32>
    %45 = math.exp %44 : vector<4x512xf32>
    %cst_16 = arith.constant 1.000000e+00 : f32
    %46 = vector.broadcast %cst_16 : f32 to vector<4x512xf32>
    %47 = arith.addf %46, %45 : vector<4x512xf32>
    %cst_17 = arith.constant 1.000000e+00 : f32
    %48 = vector.broadcast %cst_17 : f32 to vector<4x512xf32>
    %49 = arith.divf %48, %47 : vector<4x512xf32>
    %c16 = arith.constant 16 : index
    %c0_18 = arith.constant 0 : index
    %50 = vector.load %arg1[%c16, %c0_18] : memref<36x512xf32, #tpu.memory_space<vmem>>, vector<4x512xf32>
    %51 = arith.mulf %31, %49 : vector<4x512xf32>
    %52 = arith.addf %51, %50 : vector<4x512xf32>
    %c0_19 = arith.constant 0 : index
    %c0_20 = arith.constant 0 : index
    %53 = vector.load %arg4[%c0_19, %c0_20] : memref<4x512xf32, #tpu.memory_space<vmem>>, vector<4x512xf32>
    tpu.vector_store %arg4[%c0_19, %c0_20], %52 {strides = array<i32>} : memref<4x512xf32, #tpu.memory_space<vmem>>, vector<4x512xf32>,
    return
  }
  func.func @transform_0(%arg0: i32) -> (i32, i32) {
    %c0_i32 = arith.constant 0 : i32
    %c0_i32_0 = arith.constant 0 : i32
    %c0_i32_1 = arith.constant 0 : i32
    return %c0_i32, %c0_i32_0 : i32, i32
  }
  func.func @transform_1(%arg0: i32) -> (i32, i32) {
    %c0_i32 = arith.constant 0 : i32
    %c0_i32_0 = arith.constant 0 : i32
    %c0_i32_1 = arith.constant 0 : i32
    return %c0_i32, %c0_i32_0 : i32, i32
  }
  func.func @transform_2(%arg0: i32) -> (i32, i32) {
    %c0_i32 = arith.constant 0 : i32
    %c0_i32_0 = arith.constant 0 : i32
    %c0_i32_1 = arith.constant 0 : i32
    return %c0_i32, %c0_i32_0 : i32, i32
  }
  func.func @transform_3(%arg0: i32) -> (i32, i32) {
    %c0_i32 = arith.constant 0 : i32
    %c0_i32_0 = arith.constant 0 : i32
    %c0_i32_1 = arith.constant 0 : i32
    return %c0_i32, %c0_i32_0 : i32, i32
  }
}

</mosaic_0001>

<bundles_post_ra>
// kernel: tpu_custom_call.1
= control target key start
LH: loop header
LB: loop body
LE: loop exit
PB: predicated region body
PF: predicated region fallthrough
CT: control target
= control target key end

     0   :  { %8 = vsyncpa [#allocation3], 0  ;;  %s982_s0 = inlined_call_operand.hbm [shape: f32[36,512], index: 0, kind: input, shape index: {}]   ;;  %s983_s1 = inlined_call_operand.hbm [shape: f32[4,512], index: 1, kind: input, shape index: {}]   ;;  %s984_s2 = inlined_call_operand.hbm [shape: f32[4,52], index: 2, kind: input, shape index: {}]   ;;  %s985_s3 = inlined_call_operand.hbm [shape: f32[4,512], index: 3, kind: output, shape index: {}]  }
   0x1   :  { %9 = vsyncpa [#allocation6], 0  ;;  %s29_s14 = sshll.u32 %s983_s1, 4  ;;  %s30_s14 = int_to_ptr.hbm [resolvable:$true] %s29_s14 }
   0x2   :  { %10 = vsyncpa [#allocation4], 0  ;;  %s837_s15 = smov [#allocation5]   ;;  %s15_s19 = sshll.u32 %s982_s0, 4  ;;  %s16_s19 = int_to_ptr.hbm [resolvable:$true] %s15_s19 }
   0x3   :  { %s31_s16 = sshll.u32 %s837_s15, 4  ;;  %s838_s20 = smov [#allocation2]   ;;  %s32_s16 = int_to_ptr.vmem [resolvable:$true] %s31_s16 }
   0x4   :  { %34 = dma.hbm_to_vmem [thread:$0]  %s30_s14, 256, %s32_s16, [#allocation6]  }
   0x5   :  { %s17_s21 = sshll.u32 %s838_s20, 4  ;;  %s839_s22 = smov 512   ;;  %s18_s21 = int_to_ptr.vmem [resolvable:$true] %s17_s21 }
   0x6   :  { %s840_s23 = smov 32   ;;  %s40_s1 = sshll.u32 %s984_s2, 4  ;;  %s41_s1 = int_to_ptr.hbm [resolvable:$true] %s40_s1 }
   0x7   :  { %23 = dma.hbm_to_vmem [thread:$0]  %s16_s19, 2560, %s18_s21, [#allocation3], %s839_s22, %s839_s22, %s840_s23  }
   0x8   :  { %s841_s26 = smov [#allocation7]  }
   0x9   :  { %s42_s27 = sshll.u32 %s841_s26, 4  ;;  %s43_s27 = int_to_ptr.vmem [resolvable:$true] %s42_s27 }
   0xa   :  { %45 = dma.hbm_to_vmem [thread:$0]  %s41_s1, 64, %s43_s27, [#allocation6]  }
   0xb   :  { %831 = dma.done.wait [#allocation3], 2560  }
   0xc   :  { %832 = vsyncadd [#allocation3], 4294964736 }
   0xd   :  { %833 = dma.done.wait [#allocation6], 320  }
   0xe   :  { %834 = vsyncadd [#allocation6], 4294966976  ;;  %vm83_vm0 = vcmask 1043456   ;;  %v77_v0 = vld [vmem:[#allocation2 + $0x90] sm:$0xf]  ;;  %v74_v6 = vld [vmem:[#allocation2 + $0x78] sm:$0xff] }
   0xf   :  { %v73_v1 = vld [vmem:[#allocation2 + $0x70] sm:$0xff]  ;;  %v78_v2 = vld [vmem:[#allocation2 + $0x98] sm:$0xf]  ;;  %671 = vmatpush.msk.msra.mxu2 %vm83_vm0, %v77_v0  ;;  %v75_v3 = vld [vmem:[#allocation2 + $0x80] sm:$0xf]  ;;  %vm79_vm1 = vcmask 293888  }
  0x10   :  { %673 = vmatpush.msk.msra.mxu3 %vm83_vm0, %v78_v2  ;;  %v76_v4 = vld [vmem:[#allocation2 + $0x88] sm:$0xf]  ;;  %v69_v5 = vld [vmem:[#allocation2 + $0x50] sm:$0xff]  ;;  %667 = vmatpush.msk.msra.mxu0 %vm83_vm0, %v75_v3  ;;  %v71_v7 = vld [vmem:[#allocation2 + $0x60] sm:$0xff]  ;;  %s842_s0 = smov 88   ;;  %v843_v49 = vmov 48  }
  0x11   :  { %669 = vmatpush.msk.msra.mxu1 %vm83_vm0, %v76_v4  ;;  %v72_v8 = vld [vmem:[#allocation2 + $0x68] sm:$0xff]  ;;  %148 = vmatpush.msra.mxu2 %v73_v1  ;;  %v70_v9 = vld [vmem:[#allocation2 + $0x58] sm:$0xff]  ;;  %v67_v10 = vld [vmem:[#allocation2 + $0x40] sm:$0xff]  ;;  %v844_v52 = vmov 49   ;;  %vm250_vm2 = vcmask 31744   ;;  %s845_s2 = smov 92  }
  0x12   :  { %168 = vmatpush.msra.mxu3 %v74_v6  ;;  %108 = vmatpush.msra.mxu0 %v71_v7  ;;  %v65_v11 = vld [vmem:[#allocation2 + $0x30] sm:$0xff]  ;;  %v68_v12 = vld [vmem:[#allocation2 + $0x48] sm:$0xff]  ;;  %v66_v13 = vld [vmem:[#allocation2 + $0x38] sm:$0xff]  ;;  %s846_s28 = smov 84   ;;  %s849_s29 = smov [#allocation8]  }
  0x13   :  { %128 = vmatpush.msra.mxu1 %v72_v8  ;;  %149 = vmatpush.msra.mxu2 %v69_v5  ;;  %v63_v14 = vld [vmem:[#allocation2 + $0x20] sm:$0xff]  ;;  %v64_v15 = vld [vmem:[#allocation2 + $0x28] sm:$0xff]  ;;  %v61_v16 = vld [vmem:[#allocation2 + $0x10] sm:$0xff]  ;;  %v847_v5 = vmov 50   ;;  %s654_s30 = sshll.u32 %s849_s29, 4  ;;  %s656_s6 = sshll.u32 %s985_s3, 4  ;;  %s655_s30 = int_to_ptr.vmem [resolvable:$true] %s654_s30  ;;  %s657_s6 = int_to_ptr.hbm [resolvable:$true] %s656_s6 }
  0x14   :  { %169 = vmatpush.msra.mxu3 %v70_v9  ;;  %109 = vmatpush.msra.mxu0 %v67_v10  ;;  %v62_v17 = vld [vmem:[#allocation2 + $0x18] sm:$0xff]  ;;  %v883_v18 = vld [vmem:[#allocation7] sm:$0xf]  ;;  %v59_v19 = vld [vmem:[#allocation2] sm:$0xff] }
  0x15   :  { %129 = vmatpush.msra.mxu1 %v68_v12  ;;  %150 = vmatpush.msra.mxu2 %v65_v11  ;;  %v60_v20 = vld [vmem:[#allocation2 + $0x8] sm:$0xff]  ;;  %v237_v50 = vld [vmem:[#allocation5] sm:$0xff] }
  0x16   :  { %170 = vmatpush.msra.mxu3 %v66_v13  ;;  %110 = vmatpush.msra.mxu0 %v63_v14  ;;  %v238_v51 = vld [vmem:[#allocation5 + $0x8] sm:$0xff]  ;;  %243 = vst [vmem:[#allocation1] ss:$2 sm:$0xff] %v237_v50 }
  0x17   :  { %130 = vmatpush.msra.mxu1 %v64_v15  ;;  %151 = vmatpush.msra.mxu2 %v61_v16  ;;  %245 = vst [vmem:[#allocation1 + $0x10] ss:$2 sm:$0xff] %v238_v51 }
  0x18   :  { %171 = vmatpush.msra.mxu3 %v62_v17  ;;  %672 = vmatmul.msk.f32.vlgmr.msra.gmra.mxu2 %vm79_vm1, %v883_v18 }
  0x19   :  { %674 = vmatmul.msk.f32.vlgmr.msra.gmra.mxu3 %vm79_vm1, %v883_v18  ;;  %111 = vmatpush.msra.mxu0 %v59_v19 }
  0x1a   :  { %131 = vmatpush.msra.mxu1 %v60_v20  ;;  %668 = vmatmul.msk.f32.vlgmr.msra.gmra.mxu0 %vm79_vm1, %v883_v18 }
  0x1b   :  { %670 = vmatmul.msk.f32.vlgmr.msra.gmra.mxu1 %vm79_vm1, %v883_v18  ;;  %239 = vrot.lane.b32.xlu1 %v883_v18, %s842_s0 }
  0x1c   :  { %712 = vset.pattern.permute.xlu1 %v843_v49  ;;  %713 = vset.pattern.permute.xlu2 %v844_v52 }
  0x1d   :  { %226 = vperm.xlu2 %713, %v883_v18   ;;  %v246_v55 = vld.sshfl [vmem:[#allocation1] sm:$0xff pattern:$0x75316420]  ;;  %v247_v56 = vld.sshfl [vmem:[#allocation1 + $0x8] sm:$0xff pattern:$0x75316420]  ;;  %714 = vset.pattern.permute.xlu0 %v847_v5 }
  0x1e   :  { %675 = vmatpush.msk.msrb.mxu0 %vm83_vm0, %v246_v55  ;;  %v248_v57 = vld.sshfl [vmem:[#allocation1 + $0x10] sm:$0xff pattern:$0x75316420]  ;;  %677 = vmatpush.msk.msrb.mxu1 %vm83_vm0, %v247_v56  ;;  %v249_v59 = vld.sshfl [vmem:[#allocation1 + $0x18] sm:$0xff pattern:$0x75316420] }
  0x1f   :  { %679 = vmatpush.msk.msrb.mxu2 %vm83_vm0, %v248_v57  ;;  %681 = vmatpush.msk.msrb.mxu3 %vm83_vm0, %v249_v59 }
  0x25   :  { %341 = vrot.lane.b32.xlu2 %v883_v18, %s845_s2 }
  0x77   :  { %v227_v6 = vpop.permute.xlu2 %226 }
  0x8d   :  { %v240_v60 = vpop.permute.xlu1 %239 }
  0x8e   :  { %676 = vmatmul.msk.f32.vlgmr.msrb.gmra.mxu0 %vm250_vm2, %v240_v60  ;;  %678 = vmatmul.msk.f32.vlgmr.msrb.gmra.mxu1 %vm250_vm2, %v240_v60 }
  0x8f   :  { %680 = vmatmul.msk.f32.vlgmr.msrb.gmra.mxu2 %vm250_vm2, %v240_v60  ;;  %682 = vmatmul.msk.f32.vlgmr.msrb.gmra.mxu3 %vm250_vm2, %v240_v60 }
  0x97   :  { %v113_v21 = vpop.f32.mrf.mxu0 }
  0x98   :  { %v133_v22 = vpop.f32.mrf.mxu1  ;;  %v176_v23 = vsel %vm83_vm0, %v113_v21, 0.0 }
  0x99   :  { %v177_v24 = vsel %vm83_vm0, %v133_v22, 0.0 }
  0x9a   :  { %v178_v25 = vadd.f32 %v177_v24, %v176_v23 }
  0x9b   :  { %v153_v26 = vpop.f32.mrf.mxu2 }
  0x9c   :  { %v173_v27 = vpop.f32.mrf.mxu3  ;;  %v179_v28 = vsel %vm83_vm0, %v153_v26, 0.0 }
  0x9d   :  { %v181_v29 = vsel %vm83_vm0, %v173_v27, 0.0  ;;  %v180_v30 = vadd.f32 %v179_v28, %v178_v25 }
  0x9f   :  { %v182_v31 = vadd.f32 %v181_v29, %v180_v30 }
  0xa1   :  { %183 = vadd.xlane.f32.xlu0 %v182_v31 }
 0x10b   :  { %v278_v23 = vpop.f32.mrf.mxu0  ;;  %v298_v24 = vpop.f32.mrf.mxu1 }
 0x112   :  { %v318_v25 = vpop.f32.mrf.mxu2 }
 0x114   :  { %v184_v32 = vpop.xlane.xlu0 %183 }
 0x115   :  { %v185_v33 = vmul.f32 0.001953125, %v184_v32 }
 0x117   :  { %v893_v34 = vsub.f32 %v113_v21, %v185_v33  ;;  %v895_v35 = vsub.f32 %v133_v22, %v185_v33  ;;  %v897_v36 = vsub.f32 %v153_v26, %v185_v33  ;;  %v899_v37 = vsub.f32 %v173_v27, %v185_v33  ;;  %v342_v21 = vpop.permute.xlu2 %341  ;;  %v338_v26 = vpop.f32.mrf.mxu3 }
 0x118   :  { %v848_v22 = vmov 51  }
 0x119   :  { %v190_v38 = vmul.f32 %v893_v34, %v893_v34  ;;  %v191_v39 = vmul.f32 %v895_v35, %v895_v35  ;;  %v192_v40 = vmul.f32 %v897_v36, %v897_v36  ;;  %v193_v41 = vmul.f32 %v899_v37, %v899_v37  ;;  %715 = vset.pattern.permute.xlu2 %v848_v22 }
 0x11a   :  { %450 = vperm.xlu2 %715, %v883_v18  }
 0x11b   :  { %v194_v42 = vsel %vm83_vm0, %v190_v38, 0.0  ;;  %v195_v43 = vsel %vm83_vm0, %v191_v39, 0.0  ;;  %v197_v45 = vsel %vm83_vm0, %v192_v40, 0.0  ;;  %v199_v47 = vsel %vm83_vm0, %v193_v41, 0.0 }
 0x11c   :  { %v196_v44 = vadd.f32 %v195_v43, %v194_v42 }
 0x11e   :  { %v198_v46 = vadd.f32 %v197_v45, %v196_v44 }
 0x120   :  { %v200_v48 = vadd.f32 %v199_v47, %v198_v46 }
 0x122   :  { %201 = vadd.xlane.f32.xlu0 %v200_v48 }
 0x136   :  { %438 = vperm.xlu0 %714, %v883_v18  }
 0x13e   :  { %716 = vset.pattern.permute.xlu0 %v848_v22 }
 0x174   :  { %v451_v44 = vpop.permute.xlu2 %450 }
 0x195   :  { %v202_v53 = vpop.xlane.xlu0 %201 }
 0x196   :  { %v203_v54 = vmul.f32 0.001953125, %v202_v53 }
 0x198   :  { %v204_v58 = vadd.f32 1e-05, %v203_v54 }
 0x19a   :  { %717 = vrsqrt.f32 %v204_v58  ;;  %vm211_vm4 = vweird.f32 %v204_v58 }
 0x1a0   :  { %v718_v61 = vpop.eup %717 }
 0x1a1   :  { %v206_v62 = vmul.f32 %v718_v61, %v204_v58  ;;  %vm212_vm3 = vweird.f32 %v718_v61 }
 0x1a2   :  { %vm213_vm5 = vmor %vm211_vm4, %vm212_vm3 }
 0x1a3   :  { %v207_v63 = vmul.f32 %v718_v61, %v206_v62 }
 0x1a5   :  { %v208_v0 = vmul.f32 0.5, %v207_v63 }
 0x1a7   :  { %v209_v1 = vsub.f32 1.5, %v208_v0 }
 0x1a8   :  { %v439_v27 = vpop.permute.xlu0 %438 }
 0x1a9   :  { %v210_v2 = vmul.f32 %v718_v61, %v209_v1 }
 0x1ab   :  { %v214_v3 = vsel %vm213_vm5, %v718_v61, %v210_v2 }
 0x1ac   :  { %v215_v4 = vmul.f32 %v214_v3, %v883_v18 }
 0x1ae   :  { %218 = vperm.xlu1 %712, %v215_v4  }
 0x1b6   :  { %453 = vrot.lane.b32.xlu1 %v883_v18, %s846_s28 }
 0x220   :  { %v219_v7 = vpop.permute.xlu1 %218 }
 0x221   :  { %v221_v8 = vmul.f32 %v219_v7, %v893_v34  ;;  %v222_v9 = vmul.f32 %v219_v7, %v895_v35  ;;  %v223_v10 = vmul.f32 %v219_v7, %v897_v36  ;;  %v224_v11 = vmul.f32 %v219_v7, %v899_v37 }
 0x223   :  { %v931_v12 = vadd.f32 %v227_v6, %v221_v8  ;;  %v933_v13 = vadd.f32 %v227_v6, %v222_v9  ;;  %v935_v14 = vadd.f32 %v227_v6, %v223_v10  ;;  %v937_v15 = vadd.f32 %v227_v6, %v224_v11 }
 0x225   :  { %v233_v16 = vmax.f32 %v931_v12, 0.0  ;;  %v234_v17 = vmax.f32 %v933_v13, 0.0  ;;  %v235_v19 = vmax.f32 %v935_v14, 0.0  ;;  %v236_v20 = vmax.f32 %v937_v15, 0.0 }
 0x227   :  { %683 = vmatpush.msk.msra.mxu0 %vm83_vm0, %v233_v16  ;;  %685 = vmatpush.msk.msra.mxu1 %vm83_vm0, %v234_v17 }
 0x228   :  { %687 = vmatpush.msk.msra.mxu2 %vm83_vm0, %v235_v19  ;;  %689 = vmatpush.msk.msra.mxu3 %vm83_vm0, %v236_v20  ;;  %v454_v36 = vpop.permute.xlu1 %453 }
 0x229   :  { %684 = vmatmul.msk.f32.vlgmr.msra.gmra.mxu0 %vm250_vm2, %v342_v21  ;;  %686 = vmatmul.msk.f32.vlgmr.msra.gmra.mxu1 %vm250_vm2, %v342_v21 }
 0x22a   :  { %688 = vmatmul.msk.f32.vlgmr.msra.gmra.mxu2 %vm250_vm2, %v342_v21  ;;  %690 = vmatmul.msk.f32.vlgmr.msra.gmra.mxu3 %vm250_vm2, %v342_v21 }
 0x2a6   :  { %v374_v28 = vpop.f32.mrf.mxu0  ;;  %v394_v29 = vpop.f32.mrf.mxu1 }
 0x2a7   :  { %v375_v30 = vadd.f32 %v374_v28, %v278_v23  ;;  %v395_v31 = vadd.f32 %v394_v29, %v298_v24 }
 0x2a9   :  { %v441_v32 = vadd.f32 %v439_v27, %v375_v30  ;;  %v442_v33 = vadd.f32 %v439_v27, %v395_v31 }
 0x2ab   :  { %v445_v34 = vmax.f32 %v441_v32, 0.0  ;;  %v446_v35 = vmax.f32 %v442_v33, 0.0 }
 0x2ad   :  { %v414_v37 = vpop.f32.mrf.mxu2  ;;  %v434_v38 = vpop.f32.mrf.mxu3  ;;  %691 = vmatpush.msk.msrb.mxu0 %vm83_vm0, %v445_v34  ;;  %693 = vmatpush.msk.msrb.mxu1 %vm83_vm0, %v446_v35  ;;  %v626_v34 = vld [vmem:[#allocation2 + $0x48] sm:$0xf] }
 0x2ae   :  { %v415_v18 = vadd.f32 %v414_v37, %v318_v25  ;;  %v435_v39 = vadd.f32 %v434_v38, %v338_v26  ;;  %692 = vmatmul.msk.f32.vlgmr.msrb.gmra.mxu0 %vm250_vm2, %v454_v36  ;;  %694 = vmatmul.msk.f32.vlgmr.msrb.gmra.mxu1 %vm250_vm2, %v454_v36  ;;  %v625_v37 = vld [vmem:[#allocation2 + $0x40] sm:$0xf] }
 0x2b0   :  { %v443_v40 = vadd.f32 %v439_v27, %v415_v18  ;;  %v444_v41 = vadd.f32 %v439_v27, %v435_v39 }
 0x2b2   :  { %v447_v42 = vmax.f32 %v443_v40, 0.0  ;;  %v448_v43 = vmax.f32 %v444_v41, 0.0 }
 0x2b4   :  { %695 = vmatpush.msk.msrb.mxu2 %vm83_vm0, %v447_v42  ;;  %697 = vmatpush.msk.msrb.mxu3 %vm83_vm0, %v448_v43 }
 0x2b5   :  { %696 = vmatmul.msk.f32.vlgmr.msrb.gmra.mxu2 %vm250_vm2, %v454_v36  ;;  %698 = vmatmul.msk.f32.vlgmr.msrb.gmra.mxu3 %vm250_vm2, %v454_v36 }
 0x32b   :  { %v486_v45 = vpop.f32.mrf.mxu0  ;;  %v506_v46 = vpop.f32.mrf.mxu1 }
 0x32c   :  { %v487_v47 = vadd.f32 %v486_v45, %v451_v44  ;;  %v507_v48 = vadd.f32 %v506_v46, %v451_v44 }
 0x32e   :  { %v549_v49 = vsub.f32 0.0, %v487_v47  ;;  %v550_v50 = vsub.f32 0.0, %v507_v48 }
 0x330   :  { %v553_v51 = vmul.f32 1.442695, %v549_v49  ;;  %v555_v52 = vmul.f32 1.442695, %v550_v50 }
 0x332   :  { %719 = vpow2.f32 %v553_v51 }
 0x333   :  { %721 = vpow2.f32 %v555_v52 }
 0x338   :  { %v720_v53 = vpop.eup %719  ;;  %v526_v54 = vpop.f32.mrf.mxu2 }
 0x339   :  { %v546_v55 = vpop.f32.mrf.mxu3  ;;  %v722_v56 = vpop.eup %721  ;;  %v561_v57 = vadd.f32 1.0, %v720_v53  ;;  %v527_v58 = vadd.f32 %v526_v54, %v451_v44 }
 0x33a   :  { %v547_v59 = vadd.f32 %v546_v55, %v451_v44  ;;  %v562_v60 = vadd.f32 1.0, %v722_v56 }
 0x33b   :  { %723 = vrcp.f32 %v561_v57  ;;  %v551_v61 = vsub.f32 0.0, %v527_v58  ;;  %vm570_vm6 = vweird.f32 %v561_v57  ;;  %v574_v8 = vand.u32 2147483647, %v561_v57 }
 0x33c   :  { %725 = vrcp.f32 %v562_v60  ;;  %v552_v62 = vsub.f32 0.0, %v547_v59  ;;  %v576_v9 = vand.u32 2147483648, %v561_v57  ;;  %vm585_vm8 = vweird.f32 %v562_v60 }
 0x33d   :  { %v557_v63 = vmul.f32 1.442695, %v551_v61  ;;  %v591_v21 = vand.u32 2147483648, %v562_v60  ;;  %v589_v24 = vand.u32 2147483647, %v562_v60  ;;  %vm575_vm13 = vcmp.eq.f32.partialorder %v574_v8, 8.507059e+37 }
 0x33e   :  { %v559_v0 = vmul.f32 1.442695, %v552_v62  ;;  %v577_v28 = vor.u32 1.1754944e-38, %v576_v9 }
 0x33f   :  { %727 = vpow2.f32 %v557_v63  ;;  %v592_v29 = vor.u32 1.1754944e-38, %v591_v21  ;;  %vm590_vm12 = vcmp.eq.f32.partialorder %v589_v24, 8.507059e+37 }
 0x340   :  { %729 = vpow2.f32 %v559_v0 }
 0x341   :  { %v724_v1 = vpop.eup %723 }
 0x342   :  { %v726_v2 = vpop.eup %725  ;;  %v566_v3 = vmul.f32 %v724_v1, %v561_v57  ;;  %vm571_vm7 = vweird.f32 %v724_v1  ;;  %v628_v57 = vld [vmem:[#allocation2 + $0x58] sm:$0xf] }
 0x343   :  { %v581_v4 = vmul.f32 %v726_v2, %v562_v60  ;;  %vm586_vm9 = vweird.f32 %v726_v2  ;;  %vm572_vm10 = vmor %vm570_vm6, %vm571_vm7  ;;  %v627_v60 = vld [vmem:[#allocation2 + $0x50] sm:$0xf] }
 0x344   :  { %v567_v5 = vsub.f32 1.0, %v566_v3  ;;  %vm587_vm11 = vmor %vm585_vm8, %vm586_vm9 }
 0x345   :  { %v582_v6 = vsub.f32 1.0, %v581_v4  ;;  %v728_v10 = vpop.eup %727 }
 0x346   :  { %v568_v7 = vmul.f32 %v724_v1, %v567_v5  ;;  %v730_v22 = vpop.eup %729  ;;  %v563_v25 = vadd.f32 1.0, %v728_v10 }
 0x347   :  { %v583_v11 = vmul.f32 %v726_v2, %v582_v6  ;;  %v564_v27 = vadd.f32 1.0, %v730_v22 }
 0x348   :  { %v569_v23 = vadd.f32 %v724_v1, %v568_v7  ;;  %731 = vrcp.f32 %v563_v25  ;;  %v606_v45 = vand.u32 2147483648, %v563_v25  ;;  %v604_v12 = vand.u32 2147483647, %v563_v25 }
 0x349   :  { %v584_v26 = vadd.f32 %v726_v2, %v583_v11  ;;  %733 = vrcp.f32 %v564_v27  ;;  %vm600_vm1 = vweird.f32 %v563_v25  ;;  %vm615_vm3 = vweird.f32 %v564_v27 }
 0x34a   :  { %v573_v30 = vsel %vm572_vm10, %v724_v1, %v569_v23  ;;  %v607_v50 = vor.u32 1.1754944e-38, %v606_v45  ;;  %vm605_vm5 = vcmp.eq.f32.partialorder %v604_v12, 8.507059e+37 }
 0x34b   :  { %v588_v31 = vsel %vm587_vm11, %v726_v2, %v584_v26  ;;  %v578_v32 = vsel %vm575_vm13, %v577_v28, %v573_v30 }
 0x34c   :  { %v593_v33 = vsel %vm590_vm12, %v592_v29, %v588_v31  ;;  %v629_v35 = vmul.f32 %v578_v32, %v233_v16  ;;  %v621_v16 = vand.u32 2147483648, %v564_v27 }
 0x34d   :  { %v630_v36 = vmul.f32 %v593_v33, %v234_v17  ;;  %v619_v17 = vand.u32 2147483647, %v564_v27 }
 0x34e   :  { %v732_v38 = vpop.eup %731  ;;  %v633_v42 = vadd.f32 %v629_v35, %v625_v37  ;;  %v622_v52 = vor.u32 1.1754944e-38, %v621_v16 }
 0x34f   :  { %v634_v18 = vadd.f32 %v630_v36, %v626_v34  ;;  %v734_v39 = vpop.eup %733  ;;  %v596_v40 = vmul.f32 %v732_v38, %v563_v25  ;;  %vm601_vm14 = vweird.f32 %v732_v38  ;;  %vm620_vm6 = vcmp.eq.f32.partialorder %v619_v17, 8.507059e+37 }
 0x350   :  { %v611_v41 = vmul.f32 %v734_v39, %v564_v27  ;;  %vm616_vm15 = vweird.f32 %v734_v39  ;;  %vm602_vm2 = vmor %vm600_vm1, %vm601_vm14 }
 0x351   :  { %v641_v43 = vrot.slane %v634_v18, 4  ;;  %v597_v44 = vsub.f32 1.0, %v596_v40  ;;  %vm617_vm4 = vmor %vm615_vm3, %vm616_vm15 }
 0x352   :  { %v612_v46 = vsub.f32 1.0, %v611_v41 }
 0x353   :  { %v643_v47 = vsel %vm83_vm0, %v633_v42, %v641_v43  ;;  %v598_v48 = vmul.f32 %v732_v38, %v597_v44 }
 0x354   :  { %647 = vst [vmem:[#allocation8] sm:$0xff] %v643_v47  ;;  %v613_v13 = vmul.f32 %v734_v39, %v612_v46 }
 0x355   :  { %v599_v49 = vadd.f32 %v732_v38, %v598_v48 }
 0x356   :  { %v614_v51 = vadd.f32 %v734_v39, %v613_v13 }
 0x357   :  { %v603_v53 = vsel %vm602_vm2, %v732_v38, %v599_v49 }
 0x358   :  { %v608_v54 = vsel %vm605_vm5, %v607_v50, %v603_v53  ;;  %v618_v55 = vsel %vm617_vm4, %v734_v39, %v614_v51 }
 0x359   :  { %v623_v56 = vsel %vm620_vm6, %v622_v52, %v618_v55  ;;  %v631_v58 = vmul.f32 %v608_v54, %v235_v19 }
 0x35a   :  { %v632_v59 = vmul.f32 %v623_v56, %v236_v20 }
 0x35b   :  { %v635_v62 = vadd.f32 %v631_v58, %v627_v60 }
 0x35c   :  { %v636_v61 = vadd.f32 %v632_v59, %v628_v57 }
 0x35e   :  { %v642_v63 = vrot.slane %v636_v61, 4 }
 0x360   :  { %v644_v0 = vsel %vm83_vm0, %v635_v62, %v642_v63 }
 0x361   :  { %648 = vst [vmem:[#allocation8 + $0x8] sm:$0xff] %v644_v0 }
 0x362   :  { %659 = dma.vmem_to_hbm [thread:$0]  %s655_s30, 256, %s657_s6, [#allocation4]  }
 0x363   :  { %835 = dma.done.wait [#allocation4], 256  }
 0x364   :  { %836 = vsyncadd [#allocation4], 4294967040 }
 0x365   :  { %664 = vsyncpa [#allocation3], 1 }
 0x366   :  { %665 = vsyncpa [#allocation6], 1 }
 0x367   :  { %666 = vsyncpa [#allocation4], 1 }

</bundles_post_ra>
